<compile_context>
chip_gen: v7x
topology: tpu7x:2x2x1
jax: 0.10.0
libtpu: 0.0.40
codegen_flags: <defaults>
</compile_context>

<pallas_src>
import math
from functools import partial

import jax
import jax.numpy as jnp
from jax.experimental import pallas as pl
from jax.experimental.pallas import tpu as pltpu


def _round_up(a, m):
    return ((a + m - 1) // m) * m


def _posemb_kernel(x_ref, w_ref, o_ref, *, half_dim):
    # x_ref: (1, TB)  -- batch on the lane axis
    # w_ref: (half_dim, 1)
    # o_ref: (1 + 2*half_dim, TB): row 0 = x, rows 1..half_dim = sin,
    #        rows half_dim+1.. = cos  (transposed / feature-major layout).
    x = x_ref[...]                                        # (1, TB)
    w = w_ref[...]                                        # (half_dim, 1)
    # Same association order as PyTorch: (x * w) * 2*pi (VPU broadcast muls).
    freqs = (w * x) * jnp.float32(2.0 * math.pi)          # (half_dim, TB)
    dt = o_ref.dtype
    o_ref[0:1, :] = x.astype(dt)                          # pass-through x row
    o_ref[1:1 + half_dim, :] = jnp.sin(freqs).astype(dt)
    o_ref[1 + half_dim:, :] = jnp.cos(freqs).astype(dt)


def random_or_learned_sinusoidal_pos_emb(x, weights, *,
                                         out_dtype=jnp.float32,
                                         transposed_output=False,
                                         block_budget_bytes=4 << 20):
    """Pallas implementation of RandomOrLearnedSinusoidalPosEmb.forward.

    x: (B,) timesteps; weights: (half_dim,) module parameter.

    Returns concat([x, sin(2*pi*x*w), cos(2*pi*x*w)], -1):
      * (B, 1 + 2*half_dim)        if transposed_output=False (module layout)
      * (1 + 2*half_dim, B)        if transposed_output=True  (copy-free; the
        consumer's first Linear can contract the feature axis directly).
    """
    assert x.ndim == 1 and weights.ndim == 1
    B = x.shape[0]
    half_dim = weights.shape[0]
    rows = 1 + 2 * half_dim

    x_f32 = x.astype(jnp.float32)
    w_col = weights.astype(jnp.float32).reshape(half_dim, 1)

    # ---- lane-tile selection -------------------------------------------------
    # Budget ~4 MiB of output per block (x2 for double buffering); generation-
    # safe: well under the 16/32/32 MiB scoped-VMEM defaults of v5e/v6e/v7x.
    bytes_per_lane = rows * jnp.dtype(out_dtype).itemsize
    tb = max(128, (block_budget_bytes // bytes_per_lane) // 128 * 128)
    # At least 2 tiles so the "parallel" grid can shard across v7x's two TCs.
    tb = min(tb, _round_up(B, 256) // 2)
    B_pad = _round_up(B, 2 * tb)          # even number of full lane tiles
    grid = (B_pad // tb,)

    x_row = x_f32
    if B_pad != B:
        x_row = jnp.pad(x_row, (0, B_pad - B))
    x_row = x_row.reshape(1, B_pad)

    emb_t = pl.pallas_call(
        partial(_posemb_kernel, half_dim=half_dim),
        out_shape=jax.ShapeDtypeStruct((rows, B_pad), out_dtype),
        grid=grid,
        in_specs=[
            pl.BlockSpec((1, tb), lambda i: (0, i)),            # x lane tile
            pl.BlockSpec((half_dim, 1), lambda i: (0, 0)),      # weights (resident)
        ],
        out_specs=pl.BlockSpec((rows, tb), lambda i: (0, i)),
        compiler_params=pltpu.CompilerParams(
            dimension_semantics=("parallel",),
        ),
    )(x_row, w_col)

    if transposed_output:
        return emb_t[:, :B] if B_pad != B else emb_t
    # Module-compatible (B, 1+dim) layout: a single transpose, no concatenate.
    return (emb_t[:, :B] if B_pad != B else emb_t).T


def _reference(x, weights):
    xf = x.astype(jnp.float32)[:, None]
    freqs = xf * weights.astype(jnp.float32)[None, :] * (2.0 * math.pi)
    return jnp.concatenate([xf, jnp.sin(freqs), jnp.cos(freqs)], axis=-1)


if __name__ == "__main__":
    key = jax.random.PRNGKey(0)
    k_x, k_w, k_x2 = jax.random.split(key, 3)

    # Module-consistent small shapes: dim=16 (even) -> half_dim=8, batch=8.
    B, dim = 8, 16
    half_dim = dim // 2

    x = jax.random.uniform(k_x, (B,), dtype=jnp.float32)            # timesteps
    weights = jax.random.normal(k_w, (half_dim,), dtype=jnp.float32)
    ref = _reference(x, weights)

    # Default (module-layout) path.
    out = jax.block_until_ready(random_or_learned_sinusoidal_pos_emb(x, weights))
    assert out.shape == (B, 1 + dim)
    assert jnp.allclose(out, ref, atol=1e-4, rtol=1e-4)

    # Copy-free transposed path (consumer contracts the feature axis directly).
    out_t = jax.block_until_ready(
        random_or_learned_sinusoidal_pos_emb(x, weights, transposed_output=True))
    assert out_t.shape == (1 + dim, B)
    assert jnp.allclose(out_t, ref.T, atol=1e-4, rtol=1e-4)

    # Padded / multi-tile path: B not a multiple of 256 -> pad to 512, grid=(2,).
    B2 = 300
    x2 = jax.random.uniform(k_x2, (B2,), dtype=jnp.float32)
    out2 = jax.block_until_ready(random_or_learned_sinusoidal_pos_emb(x2, weights))
    assert out2.shape == (B2, 1 + dim)
    assert jnp.allclose(out2, _reference(x2, weights), atol=1e-4, rtol=1e-4)

    print("KERNEL_OK")
</pallas_src>

<mosaic_0001>
module attributes {stable_mosaic.version = 11 : i64} {
  func.func @_posemb_kernel(%arg0: i32, %arg1: memref<1x128xf32, #tpu.memory_space<vmem>>, %arg2: memref<8x1xf32, #tpu.memory_space<vmem>>, %arg3: memref<17x128xf32, #tpu.memory_space<vmem>>) attributes {dimension_semantics = [#tpu.dimension_semantics<parallel>], iteration_bounds = array<i64: 2>, scalar_prefetch = 0 : i64, scratch_operands = 0 : i64, tpu.core_type = #tpu.core_type<tc>, window_params = [{transform_indices = @transform_0, window_bounds = array<i64: 1, 128>}, {pipeline_mode = #tpu.pipeline_mode<synchronous>, transform_indices = @transform_1, window_bounds = array<i64: 8, 1>}, {transform_indices = @transform_2, window_bounds = array<i64: 17, 128>}]} {
    %c0 = arith.constant 0 : index
    %c0_0 = arith.constant 0 : index
    %0 = vector.load %arg1[%c0, %c0_0] : memref<1x128xf32, #tpu.memory_space<vmem>>, vector<1x128xf32>
    %c0_1 = arith.constant 0 : index
    %c0_2 = arith.constant 0 : index
    %1 = vector.load %arg2[%c0_1, %c0_2] : memref<8x1xf32, #tpu.memory_space<vmem>>, vector<8x1xf32>
    %2 = vector.broadcast %1 : vector<8x1xf32> to vector<8x128xf32>
    %3 = vector.broadcast %0 : vector<1x128xf32> to vector<8x128xf32>
    %4 = arith.mulf %2, %3 : vector<8x128xf32>
    %cst = arith.constant 6.28318548 : f32
    %5 = vector.broadcast %cst : f32 to vector<8x128xf32>
    %6 = arith.mulf %4, %5 : vector<8x128xf32>
    %c0_3 = arith.constant 0 : index
    %c0_4 = arith.constant 0 : index
    %7 = vector.load %arg3[%c0_3, %c0_4] : memref<17x128xf32, #tpu.memory_space<vmem>>, vector<1x128xf32>
    tpu.vector_store %arg3[%c0_3, %c0_4], %0 {strides = array<i32>} : memref<17x128xf32, #tpu.memory_space<vmem>>, vector<1x128xf32>,
    %8 = math.sin %6 : vector<8x128xf32>
    %c1 = arith.constant 1 : index
    %c0_5 = arith.constant 0 : index
    %9 = vector.load %arg3[%c1, %c0_5] : memref<17x128xf32, #tpu.memory_space<vmem>>, vector<8x128xf32>
    tpu.vector_store %arg3[%c1, %c0_5], %8 {strides = array<i32>} : memref<17x128xf32, #tpu.memory_space<vmem>>, vector<8x128xf32>,
    %10 = math.cos %6 : vector<8x128xf32>
    %c9 = arith.constant 9 : index
    %c0_6 = arith.constant 0 : index
    %11 = vector.load %arg3[%c9, %c0_6] : memref<17x128xf32, #tpu.memory_space<vmem>>, vector<8x128xf32>
    tpu.vector_store %arg3[%c9, %c0_6], %10 {strides = array<i32>} : memref<17x128xf32, #tpu.memory_space<vmem>>, vector<8x128xf32>,
    return
  }
  func.func @transform_0(%arg0: i32) -> (i32, i32) {
    %c0_i32 = arith.constant 0 : i32
    %c0_i32_0 = arith.constant 0 : i32
    return %c0_i32, %arg0 : i32, i32
  }
  func.func @transform_1(%arg0: i32) -> (i32, i32) {
    %c0_i32 = arith.constant 0 : i32
    %c0_i32_0 = arith.constant 0 : i32
    %c0_i32_1 = arith.constant 0 : i32
    return %c0_i32, %c0_i32_0 : i32, i32
  }
  func.func @transform_2(%arg0: i32) -> (i32, i32) {
    %c0_i32 = arith.constant 0 : i32
    %c0_i32_0 = arith.constant 0 : i32
    return %c0_i32, %arg0 : i32, i32
  }
}

</mosaic_0001>

<bundles_post_ra>
// kernel: tpu_custom_call.1
= control target key start
LH: loop header
LB: loop body
LE: loop exit
PB: predicated region body
PF: predicated region fallthrough
CT: control target
= control target key end

     0   :  { %7 = vsyncpa [#allocation3], 0  ;;  %s734_s0 = inlined_call_operand.vmem [shape: f32[1,256], index: 0, kind: input, shape index: {}]   ;;  %s735_s1 = inlined_call_operand.vmem [shape: f32[8,1], index: 1, kind: input, shape index: {}]   ;;  %s736_s2 = inlined_call_operand.hbm [shape: f32[17,256], index: 2, kind: output, shape index: {}]  }
   0x1   :  { %9 = vsyncpa [#allocation3 + $0x1], 0  ;;  %s597_s9 = smov 0   ;;  %s599_s10 = smov 0  }
   0x2   :  { %s601_s11 = smov 0   ;;  %s603_s12 = smov 0  }
   0x3 LB: > { %s618_s13 = sadd.s32 4294967295, %s569_s12   ;;  %s433_s14 = sadd.s32 4294967294, %s569_s12   ;;  %s569_s12 = sphi %s603_s12, %s742_s12   ;;  %s565_s11 = sphi %s601_s11, %s741_s11   ;;  %s561_s10 = sphi %s599_s10, %s740_s10   ;;  %s557_s9 = sphi %s597_s9, %s739_s9  }
   0x4   : > { %s622_s15 = sadd.s32 1, %s569_s12   ;;  %s69_s16 = sadd.s32 1, %s565_s11 }
   0x5   : > { %s66_s17 = ssub.s32 %s569_s12, %s622_s15  ;;  %p79_p0 = scmp.ne.s32.totalorder %s565_s11, %s561_s10 }
   0x6   : > { %p67_p1 = scmp.eq.s32.totalorder %s66_s17, 0  ;;  %p80_p2 = scmp.eq.s32.totalorder %s618_s13, 1 }
   0x7   : > { %p85_p3 = scmp.ne.s32.totalorder %s561_s10, %s557_s9  ;;  %p86_p4 = scmp.eq.s32.totalorder %s433_s14, 1 }
   0x8   : > { %s633_s18 = scalar_select %p67_p1, %s565_s11, %s69_s16  }
   0x9   : > { %p635_p5 = por %p80_p2, %p79_p0  ;;  %p639_p6 = por %p86_p4, %p85_p3 }
   0xa   : > { %p436_p7 = scmp.ge.s32.totalorder %s569_s12, 1  ;;  %p113_p8 = scmp.lt.s32.totalorder %s569_s12, 3 }
   0xc   : > { %p114_p9 = pnand %p436_p7, %p113_p8 }
   0xd   : > { %v137_v0 = vld [vmem:[%s735_s1] sm:$0xff] (!%p114_p9)  ;;  %v571_v1 = vmov (!%p114_p9), 0   ;;  %s130_s23 = sand.u32 (!%p114_p9), 1, %s561_s10   ;;  %p133_p10 = scmp.lt.s32.totalorder (!%p114_p9), %s618_s13, 1  ;;  %v144_v3 = vlaneseq (!%p114_p9)  ;;  %v572_v20 = vmov (!%p114_p9), 683565275  }
   0xe   : > { %117 = sbr.rel (%p114_p9) target bundleno = 242 (0xf2), region = 28  ;;  %502 = vset.pattern.permute.xlu0 (!%p114_p9), %v571_v1  ;;  %v573_v22 = vmov (!%p114_p9), 2475754826   ;;  %v574_v25 = vmov (!%p114_p9), 2131351028   ;;  %s445_s3 = sshll.u32 (!%p114_p9), %s618_s13, 7 }
   0xf   : > { %140 = vperm.xlu0 (!%p114_p9), %502, %v137_v0   ;;  %s448_s24 = smul.u32 (!%p114_p9), 24, %s130_s23  ;;  %v145_v4 = vshrl.u32 (!%p114_p9), %v144_v3, 7  ;;  %v575_v28 = vmov (!%p114_p9), 2102212464   ;;  %v576_v31 = vmov (!%p114_p9), 920167782   ;;  %s686_s6 = scalar_lea.hbm (!%p114_p9), %s736_s2, %s445_s3 }
  0x10   : > { %v577_v34 = vmov (!%p114_p9), 1326507024   ;;  %s693_s7 = scalar_lea.sflag (!%p114_p9), [#allocation3], %s130_s23 }
  0x11   : > { %s656_s29 = scalar_lea.vmem (!%p114_p9), [#allocation2], %s448_s24  ;;  %v146_v5 = vsub.s32 (!%p114_p9), 0, %v145_v4 }
  0x12   : > { %s374_s30 = sshll.u32 (!%p114_p9), %s656_s29, 4  ;;  %s681_s30 = int_to_ptr.vmem [resolvable:$true] %s374_s30 }
  0x13   : > { %s507_s8 = scalar_lea.vmem (!%p114_p9), %s681_s30, 384 }
  0x14   : > { %p508_p11 = scmp.ne.s32.totalorder (!%p114_p9), %s681_s30, %s507_s8 }
  0x15   : > { %s134_s25 = scalar_select %p133_p10, %s618_s13, 1 }
  0x16   : > { %p509_p12 = pnand %p508_p11, %p635_p5  ;;  %s578_s13 = smov [#allocation2]  }
  0x17   : > { %s135_s28 = scalar_lea.vmem %s734_s0, %s134_s25  ;;  %s511_s14 = sshll.u32 %s578_s13, 4  ;;  %s512_s14 = int_to_ptr.vmem [resolvable:$false] %s511_s14 }
  0x18   : > { %v136_v2 = vld [vmem:[%s135_s28] sm:$0x1]  ;;  %p510_p13 = pneg %p509_p12  ;;  %s513_s16 = scalar_lea.vmem %s512_s14, 768 }
  0x19   : > { %151 = vst [vmem:[%s656_s29] sm:$0x1] %v136_v2  ;;  %v147_v6 = vrot.slane %v136_v2, %v146_v5  ;;  %p514_p0 = scmp.lt.s32.totalorder %s681_s30, %s512_s14  ;;  %p515_p1 = scmp.lt.s32.totalorder %s513_s16, %s507_s8 }
  0x1b   : > { %p516_p2 = por %p515_p1, %p514_p0 }
  0x1d   : > { %p517_p3 = pnand %p516_p2, %p510_p13 }
  0x8e   : > { %v141_v7 = vpop.permute.xlu0 %140 }
  0x8f   : > { %v149_v8 = vmul.f32 %v147_v6, %v141_v7 }
  0x91   : > { %v659_v9 = vmul.f32 6.2831855, %v149_v8 }
  0x93   : > { %v155_v10 = vand.u32 2139095040, %v659_v9  ;;  %v152_v14 = vand.u32 2147483647, %v659_v9  ;;  %vm154_vm7 = vcmp.lt.s32.totalorder %v659_v9, 0  ;;  %vm244_vm15 = vweird.f32 %v659_v9 }
  0x95   : > { %v156_v11 = vshrl.u32 %v155_v10, 23  ;;  %v159_v17 = vand.u32 8388607, %v152_v14  ;;  %vm153_vm8 = vcmp.le.f32.partialorder %v152_v14, 0.7853982 }
  0x97   : > { %v437_v12 = vadd.s32 4294967169, %v156_v11  ;;  %v160_v36 = vor.u32 8388608, %v159_v17 }
  0x99   : > { %v162_v13 = vadd.s32 1, %v437_v12  ;;  %v200_v50 = vshll.u32 %v160_v36, 8 }
  0x9b   : > { %vm163_vm0 = vcmp.gt.s32.totalorder %v162_v13, 0 }
  0x9c   : > { %v164_v15 = vsel %vm163_vm0, %v162_v13, 0 }
  0x9d   : > { %v166_v16 = vand.u32 31, %v164_v15  ;;  %v165_v19 = vshrl.u32 %v164_v15, 5 }
  0x9f   : > { %v167_v18 = vsub.s32 32, %v166_v16  ;;  %v169_v21 = vshll.u32 %v572_v20, %v166_v16  ;;  %v172_v23 = vshll.u32 %v573_v22, %v166_v16  ;;  %v175_v27 = vshll.u32 %v574_v25, %v166_v16 }
  0xa0   : > { %v178_v30 = vshll.u32 %v575_v28, %v166_v16  ;;  %v181_v33 = vshll.u32 %v576_v31, %v166_v16  ;;  %vm184_vm1 = vcmp.lt.s32.totalorder %v165_v19, 1  ;;  %vm187_vm2 = vcmp.lt.s32.totalorder %v165_v19, 4 }
  0xa1   : > { %v170_v24 = vshrl.u32 %v573_v22, %v167_v18  ;;  %v173_v26 = vshrl.u32 %v574_v25, %v167_v18  ;;  %v176_v29 = vshrl.u32 %v575_v28, %v167_v18  ;;  %v179_v32 = vshrl.u32 %v576_v31, %v167_v18 }
  0xa2   : > { %v182_v35 = vshrl.u32 %v577_v34, %v167_v18  ;;  %v168_v45 = vshrl.u32 %v572_v20, %v167_v18  ;;  %vm186_vm3 = vcmp.lt.s32.totalorder %v165_v19, 3  ;;  %vm185_vm4 = vcmp.lt.s32.totalorder %v165_v19, 2 }
  0xa3   : > { %v171_v37 = vor.u32 %v170_v24, %v169_v21  ;;  %v174_v38 = vor.u32 %v173_v26, %v172_v23  ;;  %v177_v39 = vor.u32 %v176_v29, %v175_v27  ;;  %v180_v40 = vor.u32 %v179_v32, %v178_v30 }
  0xa4   : > { %v183_v41 = vor.u32 %v182_v35, %v181_v33 }
  0xa5   : > { %v189_v42 = vsel %vm187_vm2, %v177_v39, 2102212464  ;;  %v192_v43 = vsel %vm184_vm1, %v171_v37, %v174_v38  ;;  %v196_v44 = vsel %vm184_vm1, %v174_v38, %v177_v39  ;;  %v193_v46 = vsel %vm187_vm2, %v180_v40, 920167782 }
  0xa6   : > { %v197_v47 = vsel %vm187_vm2, %v183_v41, 1326507024  ;;  %v194_v48 = vsel %vm186_vm3, %v177_v39, %v193_v46  ;;  %v188_v51 = vsel %vm184_vm1, %v168_v45, %v171_v37  ;;  %v190_v52 = vsel %vm186_vm3, %v174_v38, %v189_v42 }
  0xa7   : > { %v198_v49 = vsel %vm186_vm3, %v180_v40, %v197_v47  ;;  %v195_v53 = vsel %vm185_vm4, %v192_v43, %v194_v48  ;;  %v191_v59 = vsel %vm185_vm4, %v188_v51, %v190_v52 }
  0xa8   : > { %v199_v54 = vsel %vm185_vm4, %v196_v44, %v198_v49  ;;  %v668_v57 = vmul.u32.u64.low %v200_v50, %v195_v53  ;;  %v669_v58 = vmul.u32.u64.high %v200_v50, %v195_v53, %v668_v57  ;;  %v207_v61 = vmul.u32 %v200_v50, %v191_v59 }
  0xa9   : > { %v665_v55 = vmul.u32.u64.low %v200_v50, %v199_v54  ;;  %v666_v56 = vmul.u32.u64.high %v200_v50, %v199_v54, %v665_v55 }
  0xaa   : > { %v210_v60 = vadd.s32 1, %v669_v58 }
  0xab   : > { %vm209_vm5 = vc.u32 %v666_v56, %v668_v57  ;;  %v208_v10 = vadd.s32 %v668_v57, %v666_v56 }
  0xac   : > { %v211_v62 = vsel %vm209_vm5, %v210_v60, %v669_v58 }
  0xad   : > { %v212_v63 = vadd.s32 %v211_v62, %v207_v61 }
  0xaf   : > { %v213_v0 = vadd.s32 536870912, %v212_v63 }
  0xb1   : > { %v214_v1 = vshrl.u32 %v213_v0, 30 }
  0xb3   : > { %v215_v2 = vshll.u32 %v214_v1, 30  ;;  %v238_v23 = vsub.s32 4, %v214_v1 }
  0xb5   : > { %v216_v3 = vsub.s32 %v212_v63, %v215_v2  ;;  %v239_v26 = vsel %vm154_vm7, %v238_v23, %v214_v1 }
  0xb6   : > { %v241_v28 = vsel %vm153_vm8, 0, %v239_v26 }
  0xb7   : > { %v218_v4 = vsub.s32 0, %v216_v3  ;;  %v245_v29 = vadd.s32 3, %v241_v28  ;;  %v350_v31 = vand.u32 3, %v241_v28 }
  0xb9   : > { %v438_v5 = vmin.u32 %v218_v4, %v216_v3  ;;  %v246_v30 = vand.u32 3, %v245_v29  ;;  %vm355_vm10 = vcmp.eq.s32.totalorder %v350_v31, 2  ;;  %vm352_vm12 = vcmp.eq.s32.totalorder %v350_v31, 0 }
  0xba   : > { %vm351_vm14 = vcmp.lt.s32.totalorder %v350_v31, 2 }
  0xbb   : > { %v220_v6 = vclz %v438_v5  ;;  %vm251_vm9 = vcmp.eq.s32.totalorder %v246_v30, 2  ;;  %vm248_vm11 = vcmp.eq.s32.totalorder %v246_v30, 0  ;;  %vm247_vm13 = vcmp.lt.s32.totalorder %v246_v30, 2 }
  0xbd   : > { %v439_v7 = vadd.s32 4294967294, %v220_v6 }
  0xbf   : > { %vm440_vm6 = vcmp.lt.s32.totalorder %v439_v7, 0 }
  0xc0   : > { %v223_v8 = vsel %vm440_vm6, 0, %v439_v7 }
  0xc1   : > { %v224_v11 = vsub.s32 32, %v223_v8  ;;  %v228_v12 = vsub.s32 4294967266, %v223_v8  ;;  %v225_v13 = vshll.u32 %v216_v3, %v223_v8 }
  0xc3   : > { %v226_v15 = vshrl.u32 %v208_v10, %v224_v11  ;;  %v229_v16 = vadd.s32 127, %v228_v12 }
  0xc5   : > { %v227_v17 = vor.u32 %v226_v15, %v225_v13  ;;  %v230_v18 = vshll.u32 %v229_v16, 23 }
  0xc7   : > { %v231_v19 = vor.u32 4788187, %v230_v18  ;;  %v234_v21 = vcvt.s32.f32 %v227_v17 }
  0xc9   : > { %v232_v20 = vand.u32 2147483647, %v231_v19 }
  0xcb   : > { %v235_v22 = vmul.f32 %v234_v21, %v232_v20 }
  0xcd   : > { %v236_v24 = vxor.u32 2147483648, %v235_v22 }
  0xcf   : > { %v237_v25 = vsel %vm154_vm7, %v236_v24, %v235_v22 }
  0xd0   : > { %v240_v27 = vsel %vm153_vm8, %v659_v9, %v237_v25 }
  0xd1   : > { %503 = vcosq.f32 %v240_v27 }
  0xd2   : > { %505 = vsinq.f32 %v240_v27 }
  0xdb   : > { %v504_v32 = vpop.eup %503 }
  0xdc   : > { %v506_v33 = vpop.eup %505  ;;  %v252_v34 = vxor.u32 2147483648, %v504_v32 }
  0xdd   : > { %v249_v35 = vxor.u32 2147483648, %v506_v33 }
  0xde   : > { %v253_v14 = vsel %vm251_vm9, %v252_v34, %v506_v33  ;;  %v357_v36 = vsel %vm355_vm10, %v252_v34, %v506_v33 }
  0xdf   : > { %v250_v37 = vsel %vm248_vm11, %v504_v32, %v249_v35  ;;  %v354_v38 = vsel %vm352_vm12, %v504_v32, %v249_v35 }
  0xe0   : > { %v254_v39 = vsel %vm247_vm13, %v250_v37, %v253_v14  ;;  %v358_v40 = vsel %vm351_vm14, %v354_v38, %v357_v36 }
  0xe1   : > { %v255_v41 = vsel %vm244_vm15, nan, %v254_v39  ;;  %v359_v42 = vsel %vm244_vm15, nan, %v358_v40 }
  0xe2   : > { %256 = vst [vmem:[%s656_s29 + $0x1] sm:$0xff] %v255_v41  ;;  %360 = vst [vmem:[%s656_s29 + $0x9] sm:$0xff] %v359_v42 }
  0xe3   : > { %520 = shalt.err (!%p517_p3)
}
  0xe4   : > { %s521_s17 = scalar_lea.hbm %s686_s6, 384  ;;  %s525_s23 = scalar_lea.hbm %s736_s2, 768 }
  0xe5   : > { %p522_p4 = scmp.ne.s32.totalorder %s686_s6, %s521_s17  ;;  %p526_p9 = scmp.lt.u32.totalorder %s686_s6, %s736_s2 }
  0xe6   : > { %p527_p10 = scmp.lt.u32.totalorder %s525_s23, %s521_s17  ;;  %p529_p12 = scmp.lt.u32.totalorder %s521_s17, %s686_s6 }
  0xe7   : > { %p523_p7 = pnand %p522_p4, %p635_p5 }
  0xe8   : > { %p528_p11 = por %p527_p10, %p526_p9 }
  0xe9   : > { %p524_p8 = pneg %p523_p7 }
  0xea   : > { %p530_p13 = por %p529_p12, %p528_p11 }
  0xec   : > { %p531_p0 = pnand %p530_p13, %p524_p8 }
  0xee   : > { %534 = shalt.err (!%p531_p0)
}
  0xef   : > { %s579_s26 = smov 128   ;;  %s580_s27 = smov 256  }
  0xf0   : > { %s581_s28 = smov 8  }
  0xf1   : > { %453 = dma.vmem_to_hbm [thread:$0]  (%p635_p5), %s681_s30, 384, %s686_s6, %s693_s7, %s579_s26, %s580_s27, %s581_s28  }
  0xf2 PF: > { %p459_p1 = scmp.ge.s32.totalorder %s569_s12, 2  ;;  %s389_s29 = sand.u32 1, %s557_s9  }
  0xf3   : > { %s390_s3 = scalar_lea.sflag [#allocation3], %s389_s29 }
  0xf4   : > { %p456_p2 = pnand %p459_p1, %p639_p6 }
  0xf6   : > { %552 = dma.done.wait (!%p456_p2), %s390_s3, 384  }
  0xf7   : > { %554 = vsyncadd (!%p456_p2), %s390_s3, 4294966912  ;;  %p12_p3 = scmp.ge.s32.totalorder %s622_s15, 4   ;;  %s739_s9 = smov %s561_s10 }
  0xf8   : > { %s740_s10 = smov %s565_s11  ;;  %s741_s11 = smov %s633_s18 }
  0xf9   : > { %s742_s12 = smov %s622_s15  ;;  %14 = sbr.rel (!%p12_p3) target bundleno = 3 (0x3), region = 63 }
 0x100   :  { %395 = vsyncpa [#allocation3], 1 }
 0x101   :  { %397 = vsyncpa [#allocation3 + $0x1], 1 }

</bundles_post_ra>
